<compile_context>
chip_gen: v5e
topology: v5e:2x2
jax: 0.10.0
libtpu: 0.0.40
codegen_flags: <defaults>
</compile_context>

<pallas_src>
import functools

import jax
import jax.numpy as jnp
from jax.experimental import pallas as pl
from jax.experimental.pallas import tpu as pltpu


# ----------------------------- VMEM / tile policy ---------------------------

def _physical_vmem_bytes():
    """Per-core VMEM capacity; conservative fallback = v7x (64 MiB / TC)."""
    try:
        return int(pltpu.get_tpu_info().vmem_capacity_bytes)
    except Exception:
        return 64 << 20


def _vmem_limit_bytes():
    # Scoped-VMEM limit requested from Mosaic:
    #   v5e / v6e (128 MiB physical) -> 96 MiB,   v7x (64 MiB / TC) -> 48 MiB.
    return min(_physical_vmem_bytes() * 3 // 4, 96 << 20)


def _choose_tiles(m, hw, itemsize, nbuf):
    """Pick (row_tile, lane_tile) so that `nbuf` live (tm, thw) buffers fit the
    VMEM budget.  nbuf=2 for the pool pass (double-buffered input only),
    nbuf=4 for the scale pass (input + output, double-buffered)."""
    budget = _vmem_limit_bytes() - (8 << 20)          # headroom for Mosaic scratch
    max_elems = max(budget // (nbuf * itemsize), 8 * 128)

    thw = hw
    if hw % 128 == 0 and hw > max_elems // 512:
        # Full-width rows would force tm below ~512: tile the lane axis too so
        # per-step transfers stay in the multi-MiB sweet spot.
        thw = 128
        while thw * 2 <= max_elems // 512 and hw % (thw * 2) == 0:
            thw *= 2
    # TODO(synk): pathological case hw > ~budget/(nbuf*8*itemsize) with
    # hw % 128 != 0 would need lane padding of x; not handled here.

    tm = max((max_elems // thw) // 8 * 8, 8)          # largest multiple of 8
    if tm >= m:
        tm = m                                        # full extent is always legal
    return tm, thw


# ----------------------------- Pallas kernels ------------------------------

def _pool_kernel(x_ref, o_ref, *, inv_hw):
    """Accumulate the per-row mean of native-dtype (tm, thw) tiles into a
    resident (tm, 1) f32 output block across the lane grid axis."""
    @pl.when(pl.program_id(1) == 0)
    def _():
        o_ref[...] = jnp.zeros_like(o_ref)

    o_ref[...] += jnp.sum(x_ref[...].astype(jnp.float32), axis=-1, keepdims=True)

    @pl.when(pl.program_id(1) == pl.num_programs(1) - 1)
    def _():
        o_ref[...] *= inv_hw


def _scale_kernel(x_ref, y_ref, o_ref):
    # x: (tm, thw) native dtype, y: (tm, 1) f32 per-(b,c,d) attention scalar.
    # Broadcast across the lane axis happens in-register; no (M, HW) attention
    # tensor is ever materialised in HBM, and the output is written in x.dtype.
    o_ref[...] = (x_ref[...].astype(jnp.float32) * y_ref[...]).astype(o_ref.dtype)


def _fused_kernel(x_ref, w1_ref, b1_ref, w2_ref, b2_ref, o_ref, p_sc,
                  *, batch, inv_hw):
    """Small-problem fast path: pool + MLP + sigmoid + scale in one launch.
    x_ref / o_ref: (B, C*D, H*W), fully VMEM-resident."""
    xb = x_ref[...]                                                  # native dtype
    pooled = jnp.sum(xb.astype(jnp.float32), axis=-1) * inv_hw       # (B, CD) f32

    # Sublane-pad the tiny batch so the MXU sees >= 8 rows (padding rows are
    # row-independent through both matmuls, so their contents never leak).
    p_sc[...] = jnp.zeros_like(p_sc)
    p_sc[0:batch, :] = pooled

    h = jnp.dot(p_sc[...], w1_ref[...], preferred_element_type=jnp.float32)
    h = jnp.maximum(h + b1_ref[...], 0.0)
    z = jnp.dot(h, w2_ref[...], preferred_element_type=jnp.float32) + b2_ref[...]
    y = 1.0 / (1.0 + jnp.exp(-z))                                    # (BP, CD)

    o_ref[...] = (xb.astype(jnp.float32) * y[0:batch, :, None]).astype(o_ref.dtype)


# ----------------------------- Pallas wrappers ------------------------------

def depth_pool(x2d, *, row_tile=None, lane_tile=None):
    """Row-wise mean of a native-dtype (M, HW) matrix -> (M, 1) float32."""
    m, hw = x2d.shape
    tm, thw = _choose_tiles(m, hw, x2d.dtype.itemsize, nbuf=2)
    if row_tile is not None:
        tm = row_tile
    if lane_tile is not None:
        thw = lane_tile
    assert hw % thw == 0, "lane tile must divide H*W (partial sums would be garbage)"
    assert tm == m or tm % 8 == 0

    kernel = functools.partial(_pool_kernel, inv_hw=1.0 / hw)
    return pl.pallas_call(
        kernel,
        out_shape=jax.ShapeDtypeStruct((m, 1), jnp.float32),
        grid_spec=pltpu.PrefetchScalarGridSpec(
            num_scalar_prefetch=0,
            grid=(pl.cdiv(m, tm), pl.cdiv(hw, thw)),       # reduction axis last
            in_specs=[pl.BlockSpec((tm, thw), lambda i, j: (i, j))],
            out_specs=pl.BlockSpec((tm, 1), lambda i, j: (i, 0)),
        ),
        compiler_params=pltpu.CompilerParams(
            dimension_semantics=("parallel", "arbitrary"),
            vmem_limit_bytes=_vmem_limit_bytes(),
        ),
    )(x2d)


def depth_scale(x2d, y_col, *, row_tile=None, lane_tile=None, donate_x=False):
    """out[row, :] = x[row, :] * y[row]; lane-dense tiles, output in x.dtype."""
    m, hw = x2d.shape
    tm, thw = _choose_tiles(m, hw, x2d.dtype.itemsize, nbuf=4)
    if row_tile is not None:
        tm = row_tile
    if lane_tile is not None:
        thw = lane_tile
    assert tm == m or tm % 8 == 0

    return pl.pallas_call(
        _scale_kernel,
        out_shape=jax.ShapeDtypeStruct((m, hw), x2d.dtype),
        grid_spec=pltpu.PrefetchScalarGridSpec(
            num_scalar_prefetch=0,
            grid=(pl.cdiv(m, tm), pl.cdiv(hw, thw)),
            in_specs=[
                pl.BlockSpec((tm, thw), lambda i, j: (i, j)),
                pl.BlockSpec((tm, 1), lambda i, j: (i, 0)),
            ],
            out_specs=pl.BlockSpec((tm, thw), lambda i, j: (i, j)),
        ),
        input_output_aliases=({0: 0} if donate_x else {}),
        compiler_params=pltpu.CompilerParams(
            dimension_semantics=("parallel", "parallel"),
            vmem_limit_bytes=_vmem_limit_bytes(),
        ),
    )(x2d, y_col)


def _depth_attention_fused(x3d, w1, b1, w2, b2):
    """Single-launch path for small problems: everything VMEM-resident."""
    b, cd, hw = x3d.shape
    hid = w1.shape[1]
    bp = max(8, ((b + 7) // 8) * 8)
    kernel = functools.partial(_fused_kernel, batch=b, inv_hw=1.0 / hw)
    return pl.pallas_call(
        kernel,
        out_shape=jax.ShapeDtypeStruct((b, cd, hw), x3d.dtype),
        grid_spec=pltpu.PrefetchScalarGridSpec(
            num_scalar_prefetch=0,
            grid=(1,),
            in_specs=[
                pl.BlockSpec((b, cd, hw), lambda i: (0, 0, 0)),
                pl.BlockSpec((cd, hid), lambda i: (0, 0)),
                pl.BlockSpec((1, hid), lambda i: (0, 0)),
                pl.BlockSpec((hid, cd), lambda i: (0, 0)),
                pl.BlockSpec((1, cd), lambda i: (0, 0)),
            ],
            out_specs=pl.BlockSpec((b, cd, hw), lambda i: (0, 0, 0)),
            scratch_shapes=[pltpu.VMEM((bp, cd), jnp.float32)],
        ),
        compiler_params=pltpu.CompilerParams(
            dimension_semantics=("arbitrary",),
            vmem_limit_bytes=_vmem_limit_bytes(),
        ),
    )(x3d, w1, b1.reshape(1, hid), w2, b2.reshape(1, cd))


# ------------------------------- forward pass --------------------------------

_FUSED_MAX_ELEMS = 1 << 18    # <= 256K activations -> single-launch fast path


def depth_attention(x_ncdhw, params, *, row_tile=None, lane_tile=None,
                    donate_x=False):
    """Forward pass of DepthAttention(channel=C, depth=D) on an NCDHW tensor.
    Works on the native dtype of x and returns the same dtype."""
    b, c, d, h, w = x_ncdhw.shape
    cd = c * d
    assert params["fc1_w"].shape[0] == cd, "input C*D must match module C*D"
    m, hw = b * cd, h * w
    w1, b1 = params["fc1_w"], params["fc1_b"]
    w2, b2 = params["fc2_w"], params["fc2_b"]

    # Small-problem fast path: one pallas_call, zero intermediate HBM traffic.
    if m * hw <= _FUSED_MAX_ELEMS and row_tile is None and lane_tile is None:
        out3d = _depth_attention_fused(x_ncdhw.reshape(b, cd, hw), w1, b1, w2, b2)
        return out3d.reshape(b, c, d, h, w)

    # (B, C, D, H, W) -> (B*C*D, H*W): a pure view (no transpose, no copy,
    # native dtype preserved).
    x2d = x_ncdhw.reshape(m, hw)

    # AdaptiveAvgPool3d((D,1,1)).view(b, c*d)  == per-row mean over (H, W).
    pooled = depth_pool(x2d, row_tile=row_tile, lane_tile=lane_tile)     # (m,1) f32

    # fc: Linear(c*d -> d) -> ReLU -> Linear(d -> c*d) -> Sigmoid.
    # Tiny (B x cd) x (cd x ~D) matmuls: MXU utilization is negligible, so a
    # dedicated pallas_call buys nothing -- plain XLA, full f32 precision.
    p = pooled.reshape(b, cd)
    hidden = jax.nn.relu(
        jnp.dot(p, w1, precision=jax.lax.Precision.HIGHEST) + b1)
    y = jax.nn.sigmoid(
        jnp.dot(hidden, w2, precision=jax.lax.Precision.HIGHEST) + b2)   # (b, cd)

    # x * y.view(b, c, d, 1, 1): per-(b,c,d) scalar scaling, broadcast in-kernel.
    out2d = depth_scale(x2d, y.reshape(m, 1).astype(jnp.float32),
                        row_tile=row_tile, lane_tile=lane_tile, donate_x=donate_x)
    return out2d.reshape(b, c, d, h, w)


# ------------------------------ parameter init -------------------------------

def init_params(key, channel, depth):
    cd = channel * depth
    hid = cd // channel               # reduction = channel  ->  hidden = depth
    k1, k2, k3, k4 = jax.random.split(key, 4)
    # Weights stored as (in, out) == transpose of PyTorch nn.Linear (out, in).
    return {
        "fc1_w": 0.2 * jax.random.normal(k1, (cd, hid), jnp.float32),
        "fc1_b": 0.05 * jax.random.normal(k2, (hid,), jnp.float32),
        "fc2_w": 0.2 * jax.random.normal(k3, (hid, cd), jnp.float32),
        "fc2_b": 0.05 * jax.random.normal(k4, (cd,), jnp.float32),
    }


def _reference(x, params):
    """Plain-JAX reference (same math as the PyTorch module), full f32."""
    b, c, d, h, w = x.shape
    pooled = x.astype(jnp.float32).mean(axis=(3, 4)).reshape(b, c * d)
    hid = jax.nn.relu(
        jnp.dot(pooled, params["fc1_w"], precision=jax.lax.Precision.HIGHEST)
        + params["fc1_b"])
    y = jax.nn.sigmoid(
        jnp.dot(hid, params["fc2_w"], precision=jax.lax.Precision.HIGHEST)
        + params["fc2_b"])
    out = x.astype(jnp.float32) * y.reshape(b, c, d, 1, 1)
    return out.astype(x.dtype)


if __name__ == "__main__":
    key = jax.random.PRNGKey(0)
    kx1, kx2, kp = jax.random.split(key, 3)

    C, DEPTH = 8, 8                       # channel=8, depth=8 -> cd=64, hidden=8
    params = init_params(kp, C, DEPTH)

    # --- case 1: small shape -> fused single-launch path -------------------
    x_small = jax.random.normal(kx1, (2, C, DEPTH, 16, 16), jnp.float32)
    out_small = jax.block_until_ready(jax.jit(depth_attention)(x_small, params))
    ref_small = _reference(x_small, params)
    assert out_small.shape == x_small.shape and out_small.dtype == x_small.dtype
    assert bool(jnp.all(jnp.isfinite(out_small)))
    assert float(jnp.max(jnp.abs(out_small - ref_small))) < 5e-3

    # --- case 2: larger shape -> tiled path, forced multi-step 2-D grids ----
    x_big = jax.random.normal(kx2, (2, C, DEPTH, 64, 64), jnp.float32)
    fwd_tiled = jax.jit(functools.partial(depth_attention, row_tile=64,
                                          lane_tile=1024))
    out_big = jax.block_until_ready(fwd_tiled(x_big, params))
    ref_big = _reference(x_big, params)
    assert out_big.shape == x_big.shape and out_big.dtype == x_big.dtype
    assert float(jnp.max(jnp.abs(out_big - ref_big))) < 1e-4

    # --- case 3: bf16 input stays bf16 end-to-end (tiled path, auto tiles) --
    x_bf16 = x_big.astype(jnp.bfloat16)
    out_bf16 = jax.block_until_ready(jax.jit(depth_attention)(x_bf16, params))
    ref_bf16 = _reference(x_bf16, params)
    assert out_bf16.dtype == jnp.bfloat16
    diff = jnp.abs(out_bf16.astype(jnp.float32) - ref_bf16.astype(jnp.float32))
    assert float(jnp.max(diff)) < 6e-2

    print("KERNEL_OK")
</pallas_src>

<mosaic_0001>
module attributes {stable_mosaic.version = 11 : i64} {
  func.func @_fused_kernel(%arg0: i32, %arg1: memref<2x64x256xf32, #tpu.memory_space<vmem>>, %arg2: memref<64x8xf32, #tpu.memory_space<vmem>>, %arg3: memref<1x8xf32, #tpu.memory_space<vmem>>, %arg4: memref<8x64xf32, #tpu.memory_space<vmem>>, %arg5: memref<1x64xf32, #tpu.memory_space<vmem>>, %arg6: memref<2x64x256xf32, #tpu.memory_space<vmem>>, %arg7: memref<8x64xf32, #tpu.memory_space<vmem>>) attributes {dimension_semantics = [#tpu.dimension_semantics<arbitrary>], iteration_bounds = array<i64: 1>, scalar_prefetch = 0 : i64, scratch_operands = 1 : i64, tpu.core_type = #tpu.core_type<tc>, window_params = [{pipeline_mode = #tpu.pipeline_mode<synchronous>, transform_indices = @transform_0, window_bounds = array<i64: 2, 64, 256>}, {pipeline_mode = #tpu.pipeline_mode<synchronous>, transform_indices = @transform_1, window_bounds = array<i64: 64, 8>}, {pipeline_mode = #tpu.pipeline_mode<synchronous>, transform_indices = @transform_2, window_bounds = array<i64: 1, 8>}, {pipeline_mode = #tpu.pipeline_mode<synchronous>, transform_indices = @transform_3, window_bounds = array<i64: 8, 64>}, {pipeline_mode = #tpu.pipeline_mode<synchronous>, transform_indices = @transform_4, window_bounds = array<i64: 1, 64>}, {pipeline_mode = #tpu.pipeline_mode<synchronous>, transform_indices = @transform_5, window_bounds = array<i64: 2, 64, 256>}]} {
    %c0 = arith.constant 0 : index
    %c0_0 = arith.constant 0 : index
    %c0_1 = arith.constant 0 : index
    %0 = vector.load %arg1[%c0, %c0_0, %c0_1] : memref<2x64x256xf32, #tpu.memory_space<vmem>>, vector<2x64x256xf32>
    %cst = arith.constant dense<0.000000e+00> : vector<2x64xf32>
    %1 = vector.multi_reduction <add>, %0, %cst [2] : vector<2x64x256xf32> to vector<2x64xf32>
    %cst_2 = arith.constant 3.906250e-03 : f32
    %2 = vector.broadcast %cst_2 : f32 to vector<2x64xf32>
    %3 = arith.mulf %1, %2 : vector<2x64xf32>
    %cst_3 = arith.constant 0.000000e+00 : f32
    %4 = vector.broadcast %cst_3 : f32 to vector<8x64xf32>
    %c0_4 = arith.constant 0 : index
    %c0_5 = arith.constant 0 : index
    %5 = vector.load %arg7[%c0_4, %c0_5] : memref<8x64xf32, #tpu.memory_space<vmem>>, vector<8x64xf32>
    tpu.vector_store %arg7[%c0_4, %c0_5], %4 {strides = array<i32>} : memref<8x64xf32, #tpu.memory_space<vmem>>, vector<8x64xf32>,
    %c0_6 = arith.constant 0 : index
    %c0_7 = arith.constant 0 : index
    %6 = vector.load %arg7[%c0_6, %c0_7] : memref<8x64xf32, #tpu.memory_space<vmem>>, vector<2x64xf32>
    tpu.vector_store %arg7[%c0_6, %c0_7], %3 {strides = array<i32>} : memref<8x64xf32, #tpu.memory_space<vmem>>, vector<2x64xf32>,
    %c0_8 = arith.constant 0 : index
    %c0_9 = arith.constant 0 : index
    %7 = vector.load %arg7[%c0_8, %c0_9] : memref<8x64xf32, #tpu.memory_space<vmem>>, vector<8x64xf32>
    %c0_10 = arith.constant 0 : index
    %c0_11 = arith.constant 0 : index
    %8 = vector.load %arg2[%c0_10, %c0_11] : memref<64x8xf32, #tpu.memory_space<vmem>>, vector<64x8xf32>
    %cst_12 = arith.constant dense<0.000000e+00> : vector<8x8xf32>
    %9 = tpu.matmul %7, %8, %cst_12 {dimension_numbers = #tpu.dot_dimension_numbers<[1], [0], [0], [1], [0, 0, 1, 1], [], []>} : vector<8x64xf32>, vector<64x8xf32>, vector<8x8xf32> -> vector<8x8xf32>
    %c0_13 = arith.constant 0 : index
    %c0_14 = arith.constant 0 : index
    %10 = vector.load %arg3[%c0_13, %c0_14] : memref<1x8xf32, #tpu.memory_space<vmem>>, vector<1x8xf32>
    %11 = vector.broadcast %10 : vector<1x8xf32> to vector<8x8xf32>
    %12 = arith.addf %9, %11 : vector<8x8xf32>
    %cst_15 = arith.constant 0.000000e+00 : f32
    %13 = vector.broadcast %cst_15 : f32 to vector<8x8xf32>
    %14 = arith.maximumf %12, %13 : vector<8x8xf32>
    %c0_16 = arith.constant 0 : index
    %c0_17 = arith.constant 0 : index
    %15 = vector.load %arg4[%c0_16, %c0_17] : memref<8x64xf32, #tpu.memory_space<vmem>>, vector<8x64xf32>
    %cst_18 = arith.constant dense<0.000000e+00> : vector<8x64xf32>
    %16 = tpu.matmul %14, %15, %cst_18 {dimension_numbers = #tpu.dot_dimension_numbers<[1], [0], [0], [1], [0, 0, 1, 1], [], []>} : vector<8x8xf32>, vector<8x64xf32>, vector<8x64xf32> -> vector<8x64xf32>
    %c0_19 = arith.constant 0 : index
    %c0_20 = arith.constant 0 : index
    %17 = vector.load %arg5[%c0_19, %c0_20] : memref<1x64xf32, #tpu.memory_space<vmem>>, vector<1x64xf32>
    %18 = vector.broadcast %17 : vector<1x64xf32> to vector<8x64xf32>
    %19 = arith.addf %16, %18 : vector<8x64xf32>
    %cst_21 = arith.constant 0.000000e+00 : f32
    %20 = vector.broadcast %cst_21 : f32 to vector<8x64xf32>
    %21 = arith.subf %20, %19 : vector<8x64xf32>
    %22 = math.exp %21 : vector<8x64xf32>
    %cst_22 = arith.constant 1.000000e+00 : f32
    %23 = vector.broadcast %cst_22 : f32 to vector<8x64xf32>
    %24 = arith.addf %23, %22 : vector<8x64xf32>
    %cst_23 = arith.constant 1.000000e+00 : f32
    %25 = vector.broadcast %cst_23 : f32 to vector<8x64xf32>
    %26 = arith.divf %25, %24 : vector<8x64xf32>
    %27 = vector.extract_strided_slice %26 {offsets = [0, 0], sizes = [2, 64], strides = [1, 1]} : vector<8x64xf32> to vector<2x64xf32>
    %28 = vector.shape_cast %27 : vector<2x64xf32> to vector<2x64x1xf32>
    %29 = vector.broadcast %28 : vector<2x64x1xf32> to vector<2x64x256xf32>
    %30 = arith.mulf %0, %29 : vector<2x64x256xf32>
    %c0_24 = arith.constant 0 : index
    %c0_25 = arith.constant 0 : index
    %c0_26 = arith.constant 0 : index
    %31 = vector.load %arg6[%c0_24, %c0_25, %c0_26] : memref<2x64x256xf32, #tpu.memory_space<vmem>>, vector<2x64x256xf32>
    tpu.vector_store %arg6[%c0_24, %c0_25, %c0_26], %30 {strides = array<i32>} : memref<2x64x256xf32, #tpu.memory_space<vmem>>, vector<2x64x256xf32>,
    return
  }
  func.func @transform_0(%arg0: i32) -> (i32, i32, i32) {
    %c0_i32 = arith.constant 0 : i32
    %c0_i32_0 = arith.constant 0 : i32
    %c0_i32_1 = arith.constant 0 : i32
    %c0_i32_2 = arith.constant 0 : i32
    return %c0_i32, %c0_i32_0, %c0_i32_1 : i32, i32, i32
  }
  func.func @transform_1(%arg0: i32) -> (i32, i32) {
    %c0_i32 = arith.constant 0 : i32
    %c0_i32_0 = arith.constant 0 : i32
    %c0_i32_1 = arith.constant 0 : i32
    return %c0_i32, %c0_i32_0 : i32, i32
  }
  func.func @transform_2(%arg0: i32) -> (i32, i32) {
    %c0_i32 = arith.constant 0 : i32
    %c0_i32_0 = arith.constant 0 : i32
    %c0_i32_1 = arith.constant 0 : i32
    return %c0_i32, %c0_i32_0 : i32, i32
  }
  func.func @transform_3(%arg0: i32) -> (i32, i32) {
    %c0_i32 = arith.constant 0 : i32
    %c0_i32_0 = arith.constant 0 : i32
    %c0_i32_1 = arith.constant 0 : i32
    return %c0_i32, %c0_i32_0 : i32, i32
  }
  func.func @transform_4(%arg0: i32) -> (i32, i32) {
    %c0_i32 = arith.constant 0 : i32
    %c0_i32_0 = arith.constant 0 : i32
    %c0_i32_1 = arith.constant 0 : i32
    return %c0_i32, %c0_i32_0 : i32, i32
  }
  func.func @transform_5(%arg0: i32) -> (i32, i32, i32) {
    %c0_i32 = arith.constant 0 : i32
    %c0_i32_0 = arith.constant 0 : i32
    %c0_i32_1 = arith.constant 0 : i32
    %c0_i32_2 = arith.constant 0 : i32
    return %c0_i32, %c0_i32_0, %c0_i32_1 : i32, i32, i32
  }
}

</mosaic_0001>

<bundles_post_ra>
// kernel: depth_attention.1
= control target key start
LH: loop header
LB: loop body
LE: loop exit
PB: predicated region body
PF: predicated region fallthrough
CT: control target
= control target key end

     0   :  { %vm116_vm0 = vcmask 523264   ;;  %v462_v59 = vmov 0.0   ;;  %vm139_vm1 = vcmask 130112   ;;  %vm143_vm2 = vcmask 195712   ;;  %s858_s0 = inlined_call_operand.vmem [shape: f32[2,64,256], index: 0, kind: input, shape index: {}]   ;;  %s859_s2 = inlined_call_operand.vmem [shape: f32[1,8], index: 2, kind: input, shape index: {}]   ;;  %s860_s1 = inlined_call_operand.vmem [shape: f32[64,8], index: 1, kind: input, shape index: {}]   ;;  %s861_s4 = inlined_call_operand.vmem [shape: f32[1,64], index: 4, kind: input, shape index: {}]   ;;  %s862_s3 = inlined_call_operand.vmem [shape: f32[8,64], index: 3, kind: input, shape index: {}]   ;;  %s863_s5 = inlined_call_operand.vmem [shape: f32[2,64,256], index: 5, kind: output, shape index: {}]  }
   0x1   :  { %v496_v0 = vld [vmem:[%s858_s0 + $0x80] sm:$0xff]  ;;  %v501_v1 = vld [vmem:[%s858_s0 + $0x88] sm:$0xff]  ;;  %v532_v9 = vld [vmem:[%s858_s0 + $0x90] sm:$0xff]  ;;  %117 = vst.msk [vmem:[#allocation2] sm:$0xff] %vm116_vm0, %v462_v59  ;;  %vm147_vm3 = vcmask 261312   ;;  %vm151_vm4 = vcmask 326912  }
   0x2   :  { %v506_v2 = vld [vmem:[%s858_s0] sm:$0xff]  ;;  %v76_v3 = vadd.f32 %v501_v1, %v496_v0  ;;  %v513_v4 = vld [vmem:[%s858_s0 + $0x8] sm:$0xff]  ;;  %v537_v10 = vld [vmem:[%s858_s0 + $0x98] sm:$0xff]  ;;  %vm155_vm5 = vcmask 392512   ;;  %vm159_vm6 = vcmask 458112   ;;  %vm163_vm7 = vcmask 523712  }
   0x3   :  { %v518_v5 = vld [vmem:[%s858_s0 + $0x20] sm:$0xff]  ;;  %v523_v6 = vld [vmem:[%s858_s0 + $0x28] sm:$0xff]  ;;  %v52_v7 = vadd.f32 %v513_v4, %v506_v2  ;;  %v542_v11 = vld [vmem:[%s858_s0 + $0x10] sm:$0xff]  ;;  %v79_v15 = vadd.f32 %v537_v10, %v532_v9  ;;  %vm180_vm8 = vcmask 1041409   ;;  %vm183_vm9 = vcmask 517120  }
   0x4   :  { %v58_v8 = vadd.f32 %v523_v6, %v518_v5  ;;  %77 = vadd.xlane.f32.xlu1 %v76_v3  ;;  %v547_v12 = vld [vmem:[%s858_s0 + $0x18] sm:$0xff]  ;;  %v552_v13 = vld [vmem:[%s858_s0 + $0xa0] sm:$0xff]  ;;  %v557_v14 = vld [vmem:[%s858_s0 + $0xa8] sm:$0xff]  ;;  %vm227_vm10 = vcmask 64512  }
   0x5   :  { %53 = vadd.xlane.f32.xlu0 %v52_v7  ;;  %v55_v16 = vadd.f32 %v547_v12, %v542_v11  ;;  %v82_v17 = vadd.f32 %v557_v14, %v552_v13  ;;  %v568_v18 = vld [vmem:[%s858_s0 + $0xb0] sm:$0xff]  ;;  %v573_v19 = vld [vmem:[%s858_s0 + $0xb8] sm:$0xff]  ;;  %v588_v22 = vld [vmem:[%s858_s0 + $0x40] sm:$0xff]  ;;  %v864_v7 = vlaneseq }
   0x6   :  { %59 = vadd.xlane.f32.xlu2 %v58_v8  ;;  %v578_v20 = vld [vmem:[%s858_s0 + $0x30] sm:$0xff]  ;;  %v583_v21 = vld [vmem:[%s858_s0 + $0x38] sm:$0xff]  ;;  %v593_v23 = vld [vmem:[%s858_s0 + $0x48] sm:$0xff]  ;;  %v85_v24 = vadd.f32 %v573_v19, %v568_v18 }
   0x7   :  { %v61_v25 = vadd.f32 %v583_v21, %v578_v20  ;;  %v64_v26 = vadd.f32 %v593_v23, %v588_v22  ;;  %v604_v27 = vld [vmem:[%s858_s0 + $0x50] sm:$0xff]  ;;  %v609_v28 = vld [vmem:[%s858_s0 + $0x58] sm:$0xff]  ;;  %v614_v29 = vld [vmem:[%s858_s0 + $0xc0] sm:$0xff] }
   0x8   :  { %v619_v30 = vld [vmem:[%s858_s0 + $0xc8] sm:$0xff]  ;;  %v624_v31 = vld [vmem:[%s858_s0 + $0xd0] sm:$0xff]  ;;  %v629_v32 = vld [vmem:[%s858_s0 + $0xd8] sm:$0xff]  ;;  %v67_v33 = vadd.f32 %v609_v28, %v604_v27 }
   0x9   :  { %867 = vst [vmem:[#allocation3_spill] sm:$0xff] %v624_v31  ;;  %v88_v34 = vadd.f32 %v619_v30, %v614_v29  ;;  %v91_v35 = vadd.f32 %v629_v32, %v624_v31  ;;  %v640_v36 = vld [vmem:[%s858_s0 + $0xe0] sm:$0xff]  ;;  %v645_v37 = vld [vmem:[%s858_s0 + $0xe8] sm:$0xff]  ;;  %v660_v40 = vld [vmem:[%s858_s0 + $0x70] sm:$0xff] }
   0xa   :  { %868 = vst [vmem:[#allocation4_spill] sm:$0xff] %v629_v32  ;;  %v650_v38 = vld [vmem:[%s858_s0 + $0x60] sm:$0xff]  ;;  %v655_v39 = vld [vmem:[%s858_s0 + $0x68] sm:$0xff]  ;;  %v665_v41 = vld [vmem:[%s858_s0 + $0x78] sm:$0xff]  ;;  %v94_v42 = vadd.f32 %v645_v37, %v640_v36 }
   0xb   :  { %v70_v43 = vadd.f32 %v655_v39, %v650_v38  ;;  %v73_v44 = vadd.f32 %v665_v41, %v660_v40  ;;  %v676_v45 = vld [vmem:[%s858_s0 + $0xf0] sm:$0xff]  ;;  %v681_v46 = vld [vmem:[%s858_s0 + $0xf8] sm:$0xff]  ;;  %v191_v56 = vld [vmem:[%s860_s1 + $0x28] sm:$0xff] }
   0xc   :  { %80 = vadd.xlane.f32.xlu1 %v79_v15  ;;  %v97_v47 = vadd.f32 %v681_v46, %v676_v45  ;;  %v193_v51 = vld [vmem:[%s860_s1 + $0x38] sm:$0xff]  ;;  %v192_v55 = vld [vmem:[%s860_s1 + $0x30] sm:$0xff]  ;;  %v190_v57 = vld [vmem:[%s860_s1 + $0x20] sm:$0xff]  ;;  %v135_v15 = vand.u32 127, %v864_v7 }
   0xd   :  { %56 = vadd.xlane.f32.xlu0 %v55_v16  ;;  %209 = vmatpush.msra.mxu0 %v193_v51  ;;  %v189_v58 = vld [vmem:[%s860_s1 + $0x18] sm:$0xff]  ;;  %v188_v61 = vld [vmem:[%s860_s1 + $0x10] sm:$0xff]  ;;  %v187_v3 = vld [vmem:[%s860_s1 + $0x8] sm:$0xff] }
   0xe   :  { %83 = vadd.xlane.f32.xlu2 %v82_v17  ;;  %v186_v8 = vld [vmem:[%s860_s1] sm:$0xff] }
   0xf   :  { %210 = vmatpush.msra.mxu0 %v192_v55 }
  0x11   :  { %211 = vmatpush.msra.mxu0 %v191_v56 }
  0x13   :  { %212 = vmatpush.msra.mxu0 %v190_v57 }
  0x14   :  { %86 = vadd.xlane.f32.xlu1 %v85_v24 }
  0x15   :  { %62 = vadd.xlane.f32.xlu0 %v61_v25  ;;  %213 = vmatpush.msra.mxu0 %v189_v58  ;;  %v137_v25 = vadd.s32 4294967288, %v135_v15 }
  0x16   :  { %65 = vadd.xlane.f32.xlu2 %v64_v26 }
  0x17   :  { %214 = vmatpush.msra.mxu0 %v188_v61 }
  0x19   :  { %215 = vmatpush.msra.mxu0 %v187_v3  ;;  %v149_v3 = vadd.s32 4294967264, %v135_v15 }
  0x1b   :  { %216 = vmatpush.msra.mxu0 %v186_v8 }
  0x1c   :  { %68 = vadd.xlane.f32.xlu1 %v67_v33 }
  0x1d   :  { %89 = vadd.xlane.f32.xlu0 %v88_v34 }
  0x1e   :  { %92 = vadd.xlane.f32.xlu2 %v91_v35 }
  0x24   :  { %95 = vadd.xlane.f32.xlu1 %v94_v42  ;;  %v141_v42 = vadd.s32 4294967280, %v135_v15 }
  0x25   :  { %71 = vadd.xlane.f32.xlu0 %v70_v43 }
  0x26   :  { %74 = vadd.xlane.f32.xlu2 %v73_v44 }
  0x2d   :  { %98 = vadd.xlane.f32.xlu0 %v97_v47  ;;  %v145_v47 = vadd.s32 4294967272, %v135_v15 }
  0x77   :  { %v78_v48 = vpop.xlane.xlu1 %77 }
  0x78   :  { %v54_v49 = vpop.xlane.xlu0 %53  ;;  %v108_v33 = vmul.f32 0.00390625, %v78_v48 }
  0x79   :  { %v60_v50 = vpop.xlane.xlu2 %59  ;;  %v100_v34 = vmul.f32 0.00390625, %v54_v49 }
  0x7a   :  { %v102_v43 = vmul.f32 0.00390625, %v60_v50  ;;  %v165_v56 = vperm.slane %v108_v33, %v135_v15 }
  0x7b   :  { %v136_v57 = vperm.slane %v100_v34, %v135_v15 }
  0x7c   :  { %v142_v61 = vperm.slane %v102_v43, %v141_v42 }
  0x7f   :  { %v81_v52 = vpop.xlane.xlu1 %80 }
  0x80   :  { %v57_v53 = vpop.xlane.xlu0 %56  ;;  %v109_v35 = vmul.f32 0.00390625, %v81_v52  ;;  %v153_v52 = vadd.s32 4294967256, %v135_v15 }
  0x81   :  { %v84_v54 = vpop.xlane.xlu2 %83  ;;  %v101_v26 = vmul.f32 0.00390625, %v57_v53 }
  0x82   :  { %v110_v55 = vmul.f32 0.00390625, %v84_v54  ;;  %v166_v58 = vperm.slane %v109_v35, %v137_v25 }
  0x83   :  { %v138_v44 = vperm.slane %v101_v26, %v137_v25 }
  0x84   :  { %v168_v32 = vperm.slane %v110_v55, %v141_v42  ;;  %v167_v33 = vsel %vm139_vm1, %v166_v58, %v165_v56 }
  0x85   :  { %v140_v48 = vsel %vm139_vm1, %v138_v44, %v136_v57 }
  0x86   :  { %v169_v42 = vsel %vm143_vm2, %v168_v32, %v167_v33 }
  0x87   :  { %v87_v60 = vpop.xlane.xlu1 %86 }
  0x88   :  { %v63_v62 = vpop.xlane.xlu0 %62  ;;  %v111_v59 = vmul.f32 0.00390625, %v87_v60 }
  0x89   :  { %v66_v63 = vpop.xlane.xlu2 %65  ;;  %v103_v51 = vmul.f32 0.00390625, %v63_v62  ;;  %v157_v62 = vadd.s32 4294967248, %v135_v15 }
  0x8a   :  { %v104_v8 = vmul.f32 0.00390625, %v66_v63  ;;  %v170_v25 = vperm.slane %v111_v59, %v145_v47  ;;  %v144_v63 = vsel %vm143_vm2, %v142_v61, %v140_v48 }
  0x8b   :  { %v146_v49 = vperm.slane %v103_v51, %v145_v47 }
  0x8c   :  { %v171_v57 = vsel %vm147_vm3, %v170_v25, %v169_v42  ;;  %v869_v25 = vlaneseq }
  0x8d   :  { %v148_v43 = vsel %vm147_vm3, %v146_v49, %v144_v63 }
  0x8f   :  { %v69_v16 = vpop.xlane.xlu1 %68 }
  0x90   :  { %v90_v17 = vpop.xlane.xlu0 %89  ;;  %v105_v50 = vmul.f32 0.00390625, %v69_v16  ;;  %v161_v16 = vadd.s32 4294967240, %v135_v15 }
  0x91   :  { %v93_v24 = vpop.xlane.xlu2 %92  ;;  %v112_v7 = vmul.f32 0.00390625, %v90_v17  ;;  %v150_v17 = vperm.slane %v104_v8, %v149_v3 }
  0x92   :  { %v113_v60 = vmul.f32 0.00390625, %v93_v24  ;;  %v154_v44 = vperm.slane %v105_v50, %v153_v52  ;;  %v222_v50 = vld [vmem:[%s862_s3] sm:$0xff] }
  0x93   :  { %v172_v34 = vperm.slane %v112_v7, %v149_v3  ;;  %v152_v24 = vsel %vm151_vm4, %v150_v17, %v148_v43  ;;  %246 = vmatpush.msra.mxu1 %v222_v50 }
  0x94   :  { %v174_v56 = vperm.slane %v113_v60, %v153_v52  ;;  %v156_v59 = vsel %vm155_vm5, %v154_v44, %v152_v24  ;;  %v272_v60 = vshrl.u32 %v869_v25, 7 }
  0x95   :  { %v173_v47 = vsel %vm151_vm4, %v172_v34, %v171_v57  ;;  %v457_v34 = vld [vmem:[%s861_s4] ss:$0 sm:$0xff] }
  0x96   :  { %v175_v15 = vsel %vm155_vm5, %v174_v56, %v173_v47  ;;  %439 = vset.pattern.permute.xlu1 %v272_v60  ;;  %v285_v63 = vadd.s32 16, %v272_v60  ;;  %v279_v17 = vadd.s32 8, %v272_v60 }
  0x97   :  { %v96_v26 = vpop.xlane.xlu1 %95 }
  0x98   :  { %v72_v53 = vpop.xlane.xlu0 %71  ;;  %v114_v35 = vmul.f32 0.00390625, %v96_v26  ;;  %v456_v26 = vld [vmem:[%s859_s2] ss:$0 sm:$0xff]  ;;  %441 = vset.pattern.permute.xlu0 %v285_v63  ;;  %440 = vset.pattern.permute.xlu2 %v279_v17 }
  0x99   :  { %v106_v31 = vmul.f32 0.00390625, %v72_v53  ;;  %v75_v54 = vpop.xlane.xlu2 %74 }
  0x9a   :  { %v107_v51 = vmul.f32 0.00390625, %v75_v54  ;;  %v176_v58 = vperm.slane %v114_v35, %v157_v62 }
  0x9b   :  { %v158_v55 = vperm.slane %v106_v31, %v157_v62 }
  0x9c   :  { %v162_v61 = vperm.slane %v107_v51, %v161_v16  ;;  %v177_v32 = vsel %vm159_vm6, %v176_v58, %v175_v15  ;;  %v291_v15 = vadd.s32 24, %v272_v60 }
  0x9d   :  { %v160_v8 = vsel %vm159_vm6, %v158_v55, %v156_v59 }
  0x9e   :  { %v164_v31 = vsel %vm163_vm7, %v162_v61, %v160_v8 }
  0xa0   :  { %v99_v7 = vpop.xlane.xlu0 %98 }
  0xa1   :  { %v115_v3 = vmul.f32 0.00390625, %v99_v7 }
  0xa3   :  { %v178_v53 = vperm.slane %v115_v3, %v161_v16 }
  0xa5   :  { %v179_v48 = vsel %vm163_vm7, %v178_v53, %v177_v32  ;;  %v297_v53 = vadd.s32 32, %v272_v60 }
  0xa6   :  { %v181_v49 = vsel %vm180_vm8, %v179_v48, %v164_v31  ;;  %v309_v31 = vadd.s32 48, %v272_v60  ;;  %v303_v48 = vadd.s32 40, %v272_v60 }
  0xa7   :  { %184 = vst.msk [vmem:[#allocation2] sm:$0x3] %vm183_vm9, %v181_v49  ;;  %v315_v49 = vadd.s32 56, %v272_v60 }
  0xae   :  { %v185_v52 = vld [vmem:[#allocation2] sm:$0xff] }
  0xaf   :  { %436 = vmatmul.msk.f32.vlgmr.msra.gmra.mxu0 %vm116_vm0, %v185_v52 }
 0x12c   :  { %v218_v62 = vpop.f32.mrf.mxu0 }
 0x12d   :  { %v219_v54 = vadd.f32 %v456_v26, %v218_v62 }
 0x12f   :  { %v221_v33 = vmax.f32 %v219_v54, 0.0 }
 0x131   :  { %437 = vmatmul.msk.f32.vlgmr.msra.gmra.mxu1 %vm227_vm10, %v221_v33 }
 0x1ae   :  { %v248_v35 = vpop.f32.mrf.mxu1 }
 0x1af   :  { %v249_v43 = vadd.f32 %v457_v34, %v248_v35 }
 0x1b1   :  { %v251_v44 = vsub.f32 0.0, %v249_v43 }
 0x1b3   :  { %v252_v16 = vmul.f32 1.442695, %v251_v44 }
 0x1b5   :  { %458 = vpow2.f32 %v252_v16 }
 0x1bb   :  { %v459_v51 = vpop.eup %458 }
 0x1bc   :  { %v254_v42 = vadd.f32 1.0, %v459_v51 }
 0x1be   :  { %460 = vrcp.f32 %v254_v42  ;;  %v266_v24 = vand.u32 2147483648, %v254_v42  ;;  %v264_v58 = vand.u32 2147483647, %v254_v42  ;;  %vm260_vm12 = vweird.f32 %v254_v42 }
 0x1c0   :  { %v267_v59 = vor.u32 1.1754944e-38, %v266_v24  ;;  %vm265_vm14 = vcmp.eq.f32.partialorder %v264_v58, 8.507059e+37  ;;  %v871_v24 = vld [vmem:[#allocation4_spill] sm:$0xff] }
 0x1c4   :  { %v461_v55 = vpop.eup %460 }
 0x1c5   :  { %v256_v57 = vmul.f32 %v461_v55, %v254_v42  ;;  %vm261_vm11 = vweird.f32 %v461_v55 }
 0x1c6   :  { %vm262_vm13 = vmor %vm260_vm12, %vm261_vm11 }
 0x1c7   :  { %v257_v56 = vsub.f32 1.0, %v256_v57 }
 0x1c9   :  { %v258_v47 = vmul.f32 %v461_v55, %v257_v56 }
 0x1cb   :  { %v259_v7 = vadd.f32 %v461_v55, %v258_v47 }
 0x1cd   :  { %v263_v61 = vsel %vm262_vm13, %v461_v55, %v259_v7 }
 0x1ce   :  { %v268_v3 = vsel %vm265_vm14, %v267_v59, %v263_v61 }
 0x1cf   :  { %v270_v8 = vperm.slane %v268_v3, 0  ;;  %v319_v32 = vperm.slane %v268_v3, 1 }
 0x1d1   :  { %287 = vperm.xlu0 %441, %v270_v8   ;;  %281 = vperm.xlu2 %440, %v270_v8  }
 0x1d2   :  { %275 = vperm.xlu1 %439, %v270_v8  }
 0x1d9   :  { %448 = vset.pattern.permute.xlu0 %v279_v17  ;;  %442 = vset.pattern.permute.xlu2 %v291_v15 }
 0x1da   :  { %443 = vset.pattern.permute.xlu1 %v297_v53 }
 0x1e1   :  { %330 = vperm.xlu0 %448, %v319_v32   ;;  %293 = vperm.xlu2 %442, %v270_v8  }
 0x1e2   :  { %299 = vperm.xlu1 %443, %v270_v8  }
 0x1e9   :  { %453 = vset.pattern.permute.xlu0 %v309_v31  ;;  %444 = vset.pattern.permute.xlu2 %v303_v48 }
 0x1ea   :  { %445 = vset.pattern.permute.xlu1 %v309_v31 }
 0x1f1   :  { %360 = vperm.xlu0 %453, %v319_v32   ;;  %305 = vperm.xlu2 %444, %v270_v8  }
 0x1f2   :  { %311 = vperm.xlu1 %445, %v270_v8  }
 0x1f9   :  { %446 = vset.pattern.permute.xlu2 %v315_v49  ;;  %455 = vset.pattern.permute.xlu0 %v315_v49 }
 0x1fa   :  { %447 = vset.pattern.permute.xlu1 %v272_v60 }
 0x201   :  { %317 = vperm.xlu2 %446, %v270_v8  }
 0x202   :  { %324 = vperm.xlu1 %447, %v319_v32  }
 0x209   :  { %449 = vset.pattern.permute.xlu2 %v285_v63 }
 0x20a   :  { %450 = vset.pattern.permute.xlu1 %v291_v15 }
 0x211   :  { %336 = vperm.xlu2 %449, %v319_v32  }
 0x212   :  { %342 = vperm.xlu1 %450, %v319_v32  }
 0x219   :  { %451 = vset.pattern.permute.xlu2 %v297_v53 }
 0x21a   :  { %452 = vset.pattern.permute.xlu1 %v303_v48 }
 0x221   :  { %348 = vperm.xlu2 %451, %v319_v32  }
 0x222   :  { %354 = vperm.xlu1 %452, %v319_v32  }
 0x229   :  { %454 = vset.pattern.permute.xlu2 %v315_v49 }
 0x22b   :  { %v282_v52 = vpop.permute.xlu2 %281 }
 0x22c   :  { %v370_v50 = vmul.f32 %v282_v52, %v542_v11  ;;  %v371_v26 = vmul.f32 %v282_v52, %v547_v12 }
 0x22e   :  { %402 = vst [vmem:[%s863_s5 + $0x10] sm:$0xff] %v370_v50 }
 0x22f   :  { %403 = vst [vmem:[%s863_s5 + $0x18] sm:$0xff] %v371_v26 }
 0x231   :  { %366 = vperm.xlu2 %454, %v319_v32  }
 0x23b   :  { %v294_v62 = vpop.permute.xlu2 %293 }
 0x23c   :  { %v374_v54 = vmul.f32 %v294_v62, %v578_v20  ;;  %v375_v33 = vmul.f32 %v294_v62, %v583_v21 }
 0x23e   :  { %406 = vst [vmem:[%s863_s5 + $0x30] sm:$0xff] %v374_v54 }
 0x23f   :  { %407 = vst [vmem:[%s863_s5 + $0x38] sm:$0xff] %v375_v33 }
 0x243   :  { %v288_v11 = vpop.permute.xlu0 %287 }
 0x244   :  { %v372_v12 = vmul.f32 %v288_v11, %v518_v5  ;;  %v373_v25 = vmul.f32 %v288_v11, %v523_v6  ;;  %v276_v60 = vpop.permute.xlu1 %275 }
 0x245   :  { %v368_v63 = vmul.f32 %v276_v60, %v506_v2  ;;  %v369_v20 = vmul.f32 %v276_v60, %v513_v4 }
 0x246   :  { %404 = vst [vmem:[%s863_s5 + $0x20] sm:$0xff] %v372_v12 }
 0x247   :  { %405 = vst [vmem:[%s863_s5 + $0x28] sm:$0xff] %v373_v25 }
 0x248   :  { %400 = vst [vmem:[%s863_s5] sm:$0xff] %v368_v63 }
 0x249   :  { %401 = vst [vmem:[%s863_s5 + $0x8] sm:$0xff] %v369_v20 }
 0x24b   :  { %v306_v5 = vpop.permute.xlu2 %305 }
 0x24c   :  { %v378_v2 = vmul.f32 %v306_v5, %v604_v27  ;;  %v379_v4 = vmul.f32 %v306_v5, %v609_v28 }
 0x24e   :  { %410 = vst [vmem:[%s863_s5 + $0x50] sm:$0xff] %v378_v2 }
 0x24f   :  { %411 = vst [vmem:[%s863_s5 + $0x58] sm:$0xff] %v379_v4 }
 0x253   :  { %v331_v6 = vpop.permute.xlu0 %330 }
 0x254   :  { %v386_v21 = vmul.f32 %v331_v6, %v532_v9  ;;  %v387_v17 = vmul.f32 %v331_v6, %v537_v10  ;;  %v300_v34 = vpop.permute.xlu1 %299 }
 0x255   :  { %v376_v35 = vmul.f32 %v300_v34, %v588_v22  ;;  %v377_v27 = vmul.f32 %v300_v34, %v593_v23 }
 0x256   :  { %418 = vst [vmem:[%s863_s5 + $0x90] sm:$0xff] %v386_v21 }
 0x257   :  { %419 = vst [vmem:[%s863_s5 + $0x98] sm:$0xff] %v387_v17 }
 0x258   :  { %408 = vst [vmem:[%s863_s5 + $0x40] sm:$0xff] %v376_v35 }
 0x259   :  { %409 = vst [vmem:[%s863_s5 + $0x48] sm:$0xff] %v377_v27 }
 0x25b   :  { %v318_v9 = vpop.permute.xlu2 %317 }
 0x25c   :  { %v382_v10 = vmul.f32 %v318_v9, %v660_v40  ;;  %v383_v22 = vmul.f32 %v318_v9, %v665_v41 }
 0x25e   :  { %414 = vst [vmem:[%s863_s5 + $0x70] sm:$0xff] %v382_v10 }
 0x25f   :  { %415 = vst [vmem:[%s863_s5 + $0x78] sm:$0xff] %v383_v22 }
 0x263   :  { %v361_v23 = vpop.permute.xlu0 %360 }
 0x264   :  { %v396_v28 = vmul.f32 %v361_v23, %v640_v36  ;;  %v397_v43 = vmul.f32 %v361_v23, %v645_v37  ;;  %v312_v44 = vpop.permute.xlu1 %311 }
 0x265   :  { %v380_v16 = vmul.f32 %v312_v44, %v650_v38  ;;  %v381_v40 = vmul.f32 %v312_v44, %v655_v39 }
 0x266   :  { %428 = vst [vmem:[%s863_s5 + $0xe0] sm:$0xff] %v396_v28 }
 0x267   :  { %429 = vst [vmem:[%s863_s5 + $0xe8] sm:$0xff] %v397_v43 }
 0x268   :  { %412 = vst [vmem:[%s863_s5 + $0x60] sm:$0xff] %v380_v16 }
 0x269   :  { %413 = vst [vmem:[%s863_s5 + $0x68] sm:$0xff] %v381_v40 }
 0x26b   :  { %v337_v36 = vpop.permute.xlu2 %336 }
 0x26c   :  { %v388_v37 = vmul.f32 %v337_v36, %v552_v13  ;;  %v389_v38 = vmul.f32 %v337_v36, %v557_v14 }
 0x26e   :  { %420 = vst [vmem:[%s863_s5 + $0xa0] sm:$0xff] %v388_v37 }
 0x26f   :  { %421 = vst [vmem:[%s863_s5 + $0xa8] sm:$0xff] %v389_v38 }
 0x274   :  { %v325_v39 = vpop.permute.xlu1 %324 }
 0x275   :  { %v384_v41 = vmul.f32 %v325_v39, %v496_v0  ;;  %v385_v51 = vmul.f32 %v325_v39, %v501_v1 }
 0x277   :  { %416 = vst [vmem:[%s863_s5 + $0x80] sm:$0xff] %v384_v41 }
 0x278   :  { %417 = vst [vmem:[%s863_s5 + $0x88] sm:$0xff] %v385_v51 }
 0x27b   :  { %v349_v13 = vpop.permute.xlu2 %348 }
 0x27c   :  { %v392_v14 = vmul.f32 %v349_v13, %v614_v29  ;;  %v393_v42 = vmul.f32 %v349_v13, %v619_v30 }
 0x27e   :  { %424 = vst [vmem:[%s863_s5 + $0xc0] sm:$0xff] %v392_v14 }
 0x27f   :  { %425 = vst [vmem:[%s863_s5 + $0xc8] sm:$0xff] %v393_v42 }
 0x284   :  { %v343_v0 = vpop.permute.xlu1 %342 }
 0x285   :  { %v390_v1 = vmul.f32 %v343_v0, %v568_v18  ;;  %v391_v55 = vmul.f32 %v343_v0, %v573_v19  ;;  %v870_v19 = vld [vmem:[#allocation3_spill] sm:$0xff] }
 0x287   :  { %422 = vst [vmem:[%s863_s5 + $0xb0] sm:$0xff] %v390_v1 }
 0x288   :  { %423 = vst [vmem:[%s863_s5 + $0xb8] sm:$0xff] %v391_v55 }
 0x28b   :  { %v367_v29 = vpop.permute.xlu2 %366 }
 0x28c   :  { %v398_v30 = vmul.f32 %v367_v29, %v676_v45  ;;  %v399_v57 = vmul.f32 %v367_v29, %v681_v46 }
 0x28e   :  { %430 = vst [vmem:[%s863_s5 + $0xf0] sm:$0xff] %v398_v30 }
 0x28f   :  { %431 = vst [vmem:[%s863_s5 + $0xf8] sm:$0xff] %v399_v57 }
 0x294   :  { %v355_v18 = vpop.permute.xlu1 %354 }
 0x295   :  { %v394_v56 = vmul.f32 %v355_v18, %v870_v19  ;;  %v395_v47 = vmul.f32 %v355_v18, %v871_v24 }
 0x297   :  { %426 = vst [vmem:[%s863_s5 + $0xd0] sm:$0xff] %v394_v56 }
 0x298   :  { %427 = vst [vmem:[%s863_s5 + $0xd8] sm:$0xff] %v395_v47 }

</bundles_post_ra>
